<compile_context>
chip_gen: v6e
topology: v6e:2x2x1
jax: 0.10.0
libtpu: 0.0.40
codegen_flags: <defaults>
</compile_context>

<pallas_src>
import jax
import jax.numpy as jnp
from jax.experimental import pallas as pl
from jax.experimental.pallas import tpu as pltpu


# ----------------------------------------------------------------------------
# Helpers
# ----------------------------------------------------------------------------

def _round_down(v, m):
    return max(m, (v // m) * m)


def _vmem_config():
    """(vmem_limit_bytes, block_target_bytes) tuned per TPU generation."""
    try:
        cap = int(pltpu.get_tpu_info().vmem_capacity_bytes)
    except Exception:
        cap = 64 * 1024 * 1024  # conservative (v7x-sized) fallback
    if cap >= 128 * 1024 * 1024:
        # v5e / v6e: 128 MiB physical VMEM -> large blocks, high scoped limit.
        return 96 * 1024 * 1024, 12 * 1024 * 1024
    # v7x (64 MiB / TC) or unknown: stay within the default 32 MiB scope.
    return 32 * 1024 * 1024, 6 * 1024 * 1024


def _sublane_tile(itemsize):
    # Native packed sublane tile: 8 rows f32, 16 rows bf16, 32 rows int8/fp8.
    return {4: 8, 2: 16, 1: 32}.get(itemsize, 8)


def _choose_tiles(B, F, itemsize, target_bytes):
    """Pick (TB, TF) obeying the (8,128) block rule, ~target bytes per block."""
    sub = _sublane_tile(itemsize)
    lane_cap = _round_down(target_bytes // (sub * itemsize), 128)
    TF = F if F <= lane_cap else lane_cap            # full F, or multiple of 128
    rows = max(1, target_bytes // (TF * itemsize))
    if rows >= B or B <= sub:
        TB = B                                       # full batch dim
    else:
        TB = max(sub, _round_down(rows, sub))        # multiple of sublane tile
    return TB, TF


# ----------------------------------------------------------------------------
# Kernels
# ----------------------------------------------------------------------------

def _drop_path_rows_kernel(x_ref, scale_ref, o_ref):
    # x_ref: (TB, TF), scale_ref: (TB, 1) f32 (0 or 1/keep_prob per row).
    o_ref[...] = (x_ref[...].astype(jnp.float32) * scale_ref[...]).astype(o_ref.dtype)


def _make_sample_kernel(inv_keep_prob):
    def kernel(fetch_ref, keep_ref, x_ref, o_ref):
        # fetch_ref is only consumed by the index_maps (DMA skip); keep_ref is
        # the per-sample 0/1 flag in SMEM.
        b = pl.program_id(1)
        s = keep_ref[b].astype(jnp.float32) * inv_keep_prob
        o_ref[...] = (x_ref[...].astype(jnp.float32) * s).astype(o_ref.dtype)
    return kernel


# ----------------------------------------------------------------------------
# Pallas paths
# ----------------------------------------------------------------------------

def _row_packed_path(x_flat, scale_f32, block_target, vmem_limit):
    """Multiple batch rows per block; best when each sample is small."""
    B, F = x_flat.shape
    itemsize = jnp.dtype(x_flat.dtype).itemsize
    TB, TF = _choose_tiles(B, F, itemsize, block_target)
    grid = (pl.cdiv(B, TB), pl.cdiv(F, TF))
    scale2 = scale_f32.reshape(B, 1)
    return pl.pallas_call(
        _drop_path_rows_kernel,
        out_shape=jax.ShapeDtypeStruct((B, F), x_flat.dtype),
        grid=grid,
        in_specs=[
            pl.BlockSpec((TB, TF), lambda i, j: (i, j)),
            pl.BlockSpec((TB, 1), lambda i, j: (i, 0)),
        ],
        out_specs=pl.BlockSpec((TB, TF), lambda i, j: (i, j)),
        compiler_params=pltpu.CompilerParams(
            dimension_semantics=("parallel", "parallel"),
            vmem_limit_bytes=vmem_limit,
        ),
    )(x_flat, scale2)


def _per_sample_skip_path(x_flat, keep_i32, keep_prob, block_target, vmem_limit):
    """One sample per block; dropped samples skip the input DMA entirely."""
    B, F = x_flat.shape
    itemsize = jnp.dtype(x_flat.dtype).itemsize
    if F * itemsize <= block_target:
        TF = F                                        # full last dim
    else:
        TF = max(128, _round_down(block_target // itemsize, 128))
    nF = pl.cdiv(F, TF)

    # fetch[b] = b if sample b is kept, else the most recent kept sample <= b
    # (0 if none).  Dropped samples therefore re-use the previously fetched
    # input block -> Pallas skips the DMA; the 0 scale zeroes the output.
    idx = jnp.arange(B, dtype=jnp.int32)
    kept_idx = jnp.where(keep_i32 > 0, idx, jnp.int32(-1))
    fetch = jnp.maximum(jax.lax.cummax(kept_idx, axis=0), 0).astype(jnp.int32)

    # (B, 1, F) so the per-sample block (1, 1, TF) satisfies the block rules.
    x3 = x_flat.reshape(B, 1, F)

    grid_spec = pltpu.PrefetchScalarGridSpec(
        num_scalar_prefetch=2,
        grid=(nF, B),                                  # batch innermost: DMA reuse
        in_specs=[
            pl.BlockSpec((1, 1, TF), lambda fi, bi, fetch, keep: (fetch[bi], 0, fi)),
        ],
        out_specs=pl.BlockSpec((1, 1, TF), lambda fi, bi, fetch, keep: (bi, 0, fi)),
    )
    out3 = pl.pallas_call(
        _make_sample_kernel(float(1.0 / keep_prob)),
        out_shape=jax.ShapeDtypeStruct((B, 1, F), x_flat.dtype),
        grid_spec=grid_spec,
        compiler_params=pltpu.CompilerParams(
            dimension_semantics=("parallel", "arbitrary"),
            vmem_limit_bytes=vmem_limit,
        ),
    )(fetch, keep_i32, x3)
    return out3.reshape(B, F)


# ----------------------------------------------------------------------------
# Public entry point
# ----------------------------------------------------------------------------

def drop_path(x, *, drop_prob: float = 0.0, training: bool = True, key=None,
              min_pallas_bytes: int = 2 * 1024 * 1024,
              sample_skip_bytes: int = 256 * 1024):
    """Pallas DropPath.  x: (B, ...). Returns same shape/dtype as x."""
    if drop_prob == 0.0 or not training:
        return x
    if not (0.0 <= drop_prob <= 1.0):
        raise ValueError(f"drop_prob must be in [0, 1], got {drop_prob}")
    keep_prob = 1.0 - drop_prob
    if keep_prob <= 0.0:
        # drop_prob == 1.0 drops every sample (the torch reference would
        # divide by zero; returning zeros is the documented divergence).
        return jnp.zeros_like(x)
    if key is None:
        raise ValueError("drop_path: a PRNG `key` is required when training "
                         "with drop_prob > 0 (no deterministic default).")
    if x.size == 0:
        return x

    orig_shape = x.shape
    B = x.shape[0]
    F = 1
    for d in x.shape[1:]:
        F *= d

    # Per-sample keep mask: floor(keep_prob + U[0,1)).
    u = jax.random.uniform(key, (B,), dtype=jnp.float32)
    keep_f32 = jnp.floor(keep_prob + u)                 # 0.0 / 1.0
    scale_f32 = keep_f32 / keep_prob                     # 0 or 1/keep_prob

    itemsize = jnp.dtype(x.dtype).itemsize
    total_bytes = x.size * itemsize

    # Tiny tensors: a fused XLA broadcast-multiply beats pallas_call overhead.
    if total_bytes < min_pallas_bytes:
        bshape = (B,) + (1,) * (x.ndim - 1)
        return (x * scale_f32.reshape(bshape)).astype(x.dtype)

    vmem_limit, block_target = _vmem_config()
    x_flat = x.reshape(B, F)

    per_sample_bytes = F * itemsize
    if per_sample_bytes >= sample_skip_bytes:
        keep_i32 = keep_f32.astype(jnp.int32)
        out_flat = _per_sample_skip_path(x_flat, keep_i32, keep_prob,
                                         block_target, vmem_limit)
    else:
        out_flat = _row_packed_path(x_flat, scale_f32, block_target, vmem_limit)

    return out_flat.reshape(orig_shape)


# ----------------------------------------------------------------------------
# Self-test
# ----------------------------------------------------------------------------

def _check_samples(out, x, keep_prob, tag, tol=1e-5):
    for b in range(x.shape[0]):
        s = out[b]
        dropped = bool(jnp.all(s == 0))
        kept = bool(jnp.allclose(s.astype(jnp.float32),
                                 x[b].astype(jnp.float32) / keep_prob,
                                 rtol=tol, atol=tol))
        assert dropped or kept, f"{tag}: sample {b} neither dropped nor kept"


def _reference(x, key, keep_prob):
    B = x.shape[0]
    u = jax.random.uniform(key, (B,), dtype=jnp.float32)
    keep = jnp.floor(keep_prob + u)
    bshape = (B,) + (1,) * (x.ndim - 1)
    return (x.astype(jnp.float32) * (keep / keep_prob).reshape(bshape)).astype(x.dtype)


if __name__ == "__main__":
    root = jax.random.PRNGKey(0)
    kx, k1, k2, k3, k4 = jax.random.split(root, 5)

    # 1) Small transformer-block shape -> fused-XLA fast path.
    x1 = jax.random.normal(kx, (2, 8, 32), dtype=jnp.float32)
    out1 = jax.block_until_ready(drop_path(x1, drop_prob=0.25, training=True, key=k1))
    assert out1.shape == x1.shape and out1.dtype == x1.dtype
    _check_samples(out1, x1, 0.75, "small")
    assert bool(jnp.allclose(out1, _reference(x1, k1, 0.75), rtol=1e-5, atol=1e-5))

    # 2) Row-packed Pallas path (forced by min_pallas_bytes=0), f32.
    x2 = jax.random.normal(kx, (8, 16, 32), dtype=jnp.float32)
    out2 = jax.block_until_ready(
        drop_path(x2, drop_prob=0.25, training=True, key=k2, min_pallas_bytes=0))
    assert out2.shape == x2.shape and out2.dtype == x2.dtype
    _check_samples(out2, x2, 0.75, "rows-f32")
    assert bool(jnp.allclose(out2, _reference(x2, k2, 0.75), rtol=1e-5, atol=1e-5))

    # 3) Row-packed Pallas path, bf16 (exercises sublane-tile-aligned TB=16).
    x3 = jax.random.normal(kx, (16, 8, 32), dtype=jnp.bfloat16)
    out3 = jax.block_until_ready(
        drop_path(x3, drop_prob=0.5, training=True, key=k3, min_pallas_bytes=0))
    assert out3.shape == x3.shape and out3.dtype == x3.dtype
    _check_samples(out3, x3, 0.5, "rows-bf16", tol=2e-2)

    # 4) Per-sample DMA-skip Pallas path (forced), non-128-multiple F.
    x4 = jax.random.normal(kx, (4, 8, 36), dtype=jnp.float32)
    out4 = jax.block_until_ready(
        drop_path(x4, drop_prob=0.5, training=True, key=k4,
                  min_pallas_bytes=0, sample_skip_bytes=0))
    assert out4.shape == x4.shape and out4.dtype == x4.dtype
    _check_samples(out4, x4, 0.5, "skip")
    assert bool(jnp.allclose(out4, _reference(x4, k4, 0.5), rtol=1e-5, atol=1e-5))

    # 5) Eval mode / drop_prob == 0 return x unchanged.
    assert bool(jnp.array_equal(
        jax.block_until_ready(drop_path(x1, drop_prob=0.25, training=False)), x1))
    assert bool(jnp.array_equal(
        jax.block_until_ready(drop_path(x1, drop_prob=0.0, training=True)), x1))

    print("KERNEL_OK")
</pallas_src>

<mosaic_0001>
module attributes {stable_mosaic.version = 11 : i64} {
  func.func @_drop_path_rows_kernel(%arg0: i32, %arg1: i32, %arg2: memref<8x512xf32, #tpu.memory_space<vmem>>, %arg3: memref<8x1xf32, #tpu.memory_space<vmem>>, %arg4: memref<8x512xf32, #tpu.memory_space<vmem>>) attributes {dimension_semantics = [#tpu.dimension_semantics<parallel>, #tpu.dimension_semantics<parallel>], iteration_bounds = array<i64: 1, 1>, scalar_prefetch = 0 : i64, scratch_operands = 0 : i64, tpu.core_type = #tpu.core_type<tc>, window_params = [{transform_indices = @transform_0, window_bounds = array<i64: 8, 512>}, {transform_indices = @transform_1, window_bounds = array<i64: 8, 1>}, {transform_indices = @transform_2, window_bounds = array<i64: 8, 512>}]} {
    %c0 = arith.constant 0 : index
    %c0_0 = arith.constant 0 : index
    %0 = vector.load %arg2[%c0, %c0_0] : memref<8x512xf32, #tpu.memory_space<vmem>>, vector<8x512xf32>
    %c0_1 = arith.constant 0 : index
    %c0_2 = arith.constant 0 : index
    %1 = vector.load %arg3[%c0_1, %c0_2] : memref<8x1xf32, #tpu.memory_space<vmem>>, vector<8x1xf32>
    %2 = vector.broadcast %1 : vector<8x1xf32> to vector<8x512xf32>
    %3 = arith.mulf %0, %2 : vector<8x512xf32>
    %c0_3 = arith.constant 0 : index
    %c0_4 = arith.constant 0 : index
    %4 = vector.load %arg4[%c0_3, %c0_4] : memref<8x512xf32, #tpu.memory_space<vmem>>, vector<8x512xf32>
    tpu.vector_store %arg4[%c0_3, %c0_4], %3 {strides = array<i32>} : memref<8x512xf32, #tpu.memory_space<vmem>>, vector<8x512xf32>,
    return
  }
  func.func @transform_0(%arg0: i32, %arg1: i32) -> (i32, i32) {
    %c0_i32 = arith.constant 0 : i32
    return %arg0, %arg1 : i32, i32
  }
  func.func @transform_1(%arg0: i32, %arg1: i32) -> (i32, i32) {
    %c0_i32 = arith.constant 0 : i32
    %c0_i32_0 = arith.constant 0 : i32
    return %arg0, %c0_i32 : i32, i32
  }
  func.func @transform_2(%arg0: i32, %arg1: i32) -> (i32, i32) {
    %c0_i32 = arith.constant 0 : i32
    return %arg0, %arg1 : i32, i32
  }
}

</mosaic_0001>

<bundles_post_ra>
// kernel: tpu_custom_call.1
= control target key start
LH: loop header
LB: loop body
LE: loop exit
PB: predicated region body
PF: predicated region fallthrough
CT: control target
= control target key end

     0   :  { %7 = vsyncpa [#allocation3], 0  ;;  %s132_s0 = inlined_call_operand.hbm [shape: f32[8,512], index: 0, kind: input, shape index: {}]   ;;  %s133_s1 = inlined_call_operand.vmem [shape: f32[8,1], index: 1, kind: input, shape index: {}]   ;;  %s134_s2 = inlined_call_operand.hbm [shape: f32[8,512], index: 2, kind: output, shape index: {}]  }
   0x1   :  { %8 = vsyncpa [#allocation4], 0  ;;  %s105_s9 = smov [#allocation2]  }
   0x2   :  { %s15_s10 = sshll.u32 %s105_s9, 4  ;;  %s16_s10 = int_to_ptr.vmem [resolvable:$true] %s15_s10 }
   0x3   :  { %s69_s11 = scalar_lea.vmem %s16_s10, 512  ;;  %p74_p1 = scmp.lt.s32.totalorder %s16_s10, %s16_s10 }
   0x4   :  { %p70_p0 = scmp.ne.s32.totalorder %s16_s10, %s69_s11  ;;  %p75_p2 = scmp.lt.s32.totalorder %s69_s11, %s69_s11 }
   0x6   :  { %p76_p3 = por %p75_p2, %p74_p1 }
   0x8   :  { %p77_p4 = pnand %p76_p3, %p70_p0 }
   0xa   :  { %80 = shalt.err (!%p77_p4)
}
   0xb   :  { %18 = dma.hbm_to_vmem [thread:$0]  %s132_s0, 512, %s16_s10, [#allocation3]  }
   0xc   :  { %101 = dma.done.wait [#allocation3], 512  }
   0xd   :  { %102 = vsyncadd [#allocation3], 4294966784  ;;  %v106_v0 = vmov 0   ;;  %v28_v1 = vld [vmem:[%s133_s1] sm:$0xff]  ;;  %v25_v3 = vld [vmem:[#allocation2 + $0x8] sm:$0xff]  ;;  %s107_s16 = smov [#allocation5]  }
   0xe   :  { %60 = vset.pattern.permute.xlu0 %v106_v0  ;;  %v24_v2 = vld [vmem:[#allocation2] sm:$0xff]  ;;  %v26_v4 = vld [vmem:[#allocation2 + $0x10] sm:$0xff]  ;;  %v27_v5 = vld [vmem:[#allocation2 + $0x18] sm:$0xff]  ;;  %s48_s17 = sshll.u32 %s107_s16, 4  ;;  %s49_s17 = int_to_ptr.vmem [resolvable:$true] %s48_s17 }
   0xf   :  { %31 = vperm.xlu0 %60, %v28_v1   ;;  %s81_s0 = scalar_lea.vmem %s49_s17, 512  ;;  %p86_p6 = scmp.lt.s32.totalorder %s49_s17, %s49_s17 }
  0x10   :  { %p82_p5 = scmp.ne.s32.totalorder %s49_s17, %s81_s0  ;;  %p87_p7 = scmp.lt.s32.totalorder %s81_s0, %s81_s0 }
  0x12   :  { %p88_p8 = por %p87_p7, %p86_p6 }
  0x14   :  { %p89_p9 = pnand %p88_p8, %p82_p5 }
  0x8a   :  { %v32_v6 = vpop.permute.xlu0 %31 }
  0x8b   :  { %v34_v7 = vmul.f32 %v32_v6, %v24_v2  ;;  %v35_v8 = vmul.f32 %v32_v6, %v25_v3  ;;  %v36_v9 = vmul.f32 %v32_v6, %v26_v4  ;;  %v37_v10 = vmul.f32 %v32_v6, %v27_v5 }
  0x8d   :  { %38 = vst [vmem:[#allocation5] sm:$0xff] %v34_v7  ;;  %39 = vst [vmem:[#allocation5 + $0x8] sm:$0xff] %v35_v8 }
  0x8e   :  { %40 = vst [vmem:[#allocation5 + $0x10] sm:$0xff] %v36_v9  ;;  %41 = vst [vmem:[#allocation5 + $0x18] sm:$0xff] %v37_v10 }
  0x8f   :  { %92 = shalt.err (!%p89_p9)
}
  0x90   :  { %51 = dma.vmem_to_hbm [thread:$0]  %s49_s17, 512, %s134_s2, [#allocation4]  }
  0x91   :  { %103 = dma.done.wait [#allocation4], 512  }
  0x92   :  { %104 = vsyncadd [#allocation4], 4294966784 }
  0x93   :  { %55 = vsyncpa [#allocation3], 1 }
  0x94   :  { %56 = vsyncpa [#allocation4], 1 }

</bundles_post_ra>
